<compile_context>
chip_gen: v7x
topology: tpu7x:2x2x1
jax: 0.10.0
libtpu: 0.0.40
codegen_flags: <defaults>
</compile_context>

<pallas_src>
import math

import jax
import jax.numpy as jnp
from jax.experimental import pallas as pl
from jax.experimental.pallas import tpu as pltpu

# -------- model dimensions (small, consistent with the forward) --------
B = 2        # batch
S = 8        # sequence length
H = 32       # encoder hidden size (config.hidden_size)
FF = 128     # feed-forward dim
V = 50       # toy vocab size
NUM_CLASSES = 3
LANES = 128  # lane-dense padding width

NEG_INF = -1e9  # additive mask value (f32 throughout, no overflow concern)


# ----------------------------- kernel ---------------------------------
def _layernorm(x, g, b, eps=1e-12):
    mu = jnp.mean(x, axis=-1, keepdims=True)
    var = jnp.mean((x - mu) ** 2, axis=-1, keepdims=True)
    return (x - mu) * jax.lax.rsqrt(var + eps) * g + b


def fused_forward_kernel(
    x_ref,        # (B, S, H)   token+pos embeddings
    mask_ref,     # (B, S)      attention mask (1 = keep, 0 = pad)
    wq_ref, wk_ref, wv_ref, wo_ref,   # (H, H) each
    w1_ref,       # (H, FF)
    w2_ref,       # (FF, H)
    wp_ref,       # (H, H)      pooler dense
    wc_ref,       # (H, LANES)  classifier weight, zero-padded past NUM_CLASSES
    small_ref,    # (12, LANES) packed biases / LN params
    out_ref,      # (B, LANES)  lane-dense logits slab
):
    f32 = jnp.float32
    x = x_ref[...]                           # (B, S, H)
    m = mask_ref[...]                        # (B, S)
    small = small_ref[...]                   # (12, 128)

    # unpack small parameters (static slices)
    bq = small[0:1, :H]
    bk = small[1:2, :H]
    bv = small[2:3, :H]
    bo = small[3:4, :H]
    ln1_g = small[4:5, :H]
    ln1_b = small[5:6, :H]
    b1 = small[6:7, :FF]
    b2 = small[7:8, :H]
    ln2_g = small[8:9, :H]
    ln2_b = small[9:10, :H]
    bp = small[10:11, :H]
    bc_pad = small[11:12, :]                 # (1, 128), zeros past NUM_CLASSES

    # TODO(synk): real AutoModel is multi-layer / multi-head; this is a
    # single-layer, single-head stand-in with identical op structure.

    # ---- QKV projections as 2-D MXU matmuls over the flattened tokens ----
    x2 = x.reshape(B * S, H)                 # (16, 32)
    q = (jnp.dot(x2, wq_ref[...], preferred_element_type=f32) + bq).reshape(B, S, H)
    k = (jnp.dot(x2, wk_ref[...], preferred_element_type=f32) + bk).reshape(B, S, H)
    v = (jnp.dot(x2, wv_ref[...], preferred_element_type=f32) + bv).reshape(B, S, H)

    # ---- batched attention (dot_general: no explicit transpose of k) ----
    scale = 1.0 / math.sqrt(H)
    scores = jax.lax.dot_general(
        q, k, dimension_numbers=(((2,), (2,)), ((0,), (0,))),
        preferred_element_type=f32,
    ) * scale                                              # (B, S, S)
    scores = scores + ((1.0 - m) * NEG_INF)[:, None, :]    # mask padded keys

    s_max = jnp.max(scores, axis=-1, keepdims=True)
    e = jnp.exp(scores - s_max)
    p_attn = e * pl.reciprocal(jnp.sum(e, axis=-1, keepdims=True), approx=True)

    ctx = jax.lax.dot_general(
        p_attn, v, dimension_numbers=(((2,), (1,)), ((0,), (0,))),
        preferred_element_type=f32,
    )                                                       # (B, S, H)

    # ---- output projection + residual + LN (back in 2-D token layout) ----
    ctx2 = ctx.reshape(B * S, H)
    attn2 = jnp.dot(ctx2, wo_ref[...], preferred_element_type=f32) + bo
    h1 = _layernorm(x2 + attn2, ln1_g, ln1_b)              # (B*S, H)

    # ---- feed-forward ----
    ff = jnp.dot(h1, w1_ref[...], preferred_element_type=f32) + b1
    # TODO(synk): HF BERT default 'gelu' is erf-based; tanh approximation used here.
    ff = jax.nn.gelu(ff, approximate=True)
    ff = jnp.dot(ff, w2_ref[...], preferred_element_type=f32) + b2
    h2 = _layernorm(h1 + ff, ln2_g, ln2_b)                  # (B*S, H)

    # ---- BERT pooler on [CLS] + classification head (Dropout p=0 => identity) ----
    cls = h2.reshape(B, S, H)[:, 0, :]                      # (B, H)
    pooled = jnp.tanh(jnp.dot(cls, wp_ref[...], preferred_element_type=f32) + bp)
    out_ref[...] = (
        jnp.dot(pooled, wc_ref[...], preferred_element_type=f32) + bc_pad
    )                                                       # (B, 128) lane-dense


# ----------------------------- wrapper ---------------------------------
def _pad_row(vec, width=LANES):
    v = vec.reshape(-1).astype(jnp.float32)
    return jnp.zeros((1, width), jnp.float32).at[0, : v.shape[0]].set(v)


def fused_forward(emb, mask_f, p):
    """emb: (B, S, H) f32, mask_f: (B, S) f32 in {0,1} -> (B, LANES) logits slab."""
    # Pack the 12 tiny bias / LN vectors into one (12, 128) operand.
    small = jnp.concatenate(
        [
            _pad_row(p["bq"]), _pad_row(p["bk"]), _pad_row(p["bv"]), _pad_row(p["bo"]),
            _pad_row(p["ln1_g"]), _pad_row(p["ln1_b"]),
            _pad_row(p["b1"]), _pad_row(p["b2"]),
            _pad_row(p["ln2_g"]), _pad_row(p["ln2_b"]),
            _pad_row(p["bp"]), _pad_row(p["bc"]),
        ],
        axis=0,
    )                                                       # (12, 128)
    # Zero-pad the classifier weight to a lane-dense 128-wide output.
    wc_pad = jnp.zeros((H, LANES), jnp.float32).at[:, :NUM_CLASSES].set(p["wc"])

    vmem = pl.BlockSpec(memory_space=pltpu.MemorySpace.VMEM)
    return pl.pallas_call(
        fused_forward_kernel,
        out_shape=jax.ShapeDtypeStruct((B, LANES), jnp.float32),
        in_specs=[vmem] * 11,
        out_specs=vmem,
    )(emb, mask_f, p["wq"], p["wk"], p["wv"], p["wo"],
      p["w1"], p["w2"], p["wp"], wc_pad, small)


def model_forward(input_ids, attention_mask, params):
    """Mirror of Model.forward: returns [logits]."""
    # --- get_event_embds glue: embedding lookup (outside the kernel) ---
    emb = params["tok_emb"][input_ids] + params["pos_emb"][:S][None, :, :]  # (B, S, H)
    mask_f = attention_mask.astype(jnp.float32)                             # (B, S)

    # --- fused encoder layer + pooler + linear head + dropout(identity) ---
    logits_pad = fused_forward(emb.astype(jnp.float32), mask_f, params)     # (B, 128)
    return [logits_pad[:, :NUM_CLASSES]]                                    # (B, 3)


# ----------------------------- params -----------------------------------
def init_params(key):
    ks = jax.random.split(key, 16)
    sd = 0.02
    f = jnp.float32
    return {
        "tok_emb": jax.random.normal(ks[0], (V, H), f) * sd,
        "pos_emb": jax.random.normal(ks[1], (S, H), f) * sd,
        "wq": jax.random.normal(ks[2], (H, H), f) * sd, "bq": jnp.zeros((1, H), f),
        "wk": jax.random.normal(ks[3], (H, H), f) * sd, "bk": jnp.zeros((1, H), f),
        "wv": jax.random.normal(ks[4], (H, H), f) * sd, "bv": jnp.zeros((1, H), f),
        "wo": jax.random.normal(ks[5], (H, H), f) * sd, "bo": jnp.zeros((1, H), f),
        "ln1_g": jnp.ones((1, H), f), "ln1_b": jnp.zeros((1, H), f),
        "w1": jax.random.normal(ks[6], (H, FF), f) * sd, "b1": jnp.zeros((1, FF), f),
        "w2": jax.random.normal(ks[7], (FF, H), f) * sd, "b2": jnp.zeros((1, H), f),
        "ln2_g": jnp.ones((1, H), f), "ln2_b": jnp.zeros((1, H), f),
        # pooler (tanh dense) + classification head Linear(H -> 3)
        "wp": jax.random.normal(ks[8], (H, H), f) * sd, "bp": jnp.zeros((1, H), f),
        "wc": jax.random.normal(ks[9], (H, NUM_CLASSES), f) * sd,
        "bc": jnp.zeros((1, NUM_CLASSES), f),
    }


if __name__ == "__main__":
    key = jax.random.PRNGKey(0)
    pkey, ikey = jax.random.split(key)
    params = init_params(pkey)

    # item = {'event_ids': ..., 'event_masks': ...}
    input_ids = jax.random.randint(ikey, (B, S), 0, V, dtype=jnp.int32)
    attention_mask = jnp.array(
        [[1, 1, 1, 1, 1, 1, 1, 1],
         [1, 1, 1, 1, 1, 0, 0, 0]], dtype=jnp.int32
    )

    outputs = model_forward(input_ids, attention_mask, params)
    logits = jax.block_until_ready(outputs[0])
    assert logits.shape == (B, NUM_CLASSES) and logits.dtype == jnp.float32
    print("KERNEL_OK")
</pallas_src>

<mosaic_0001>
module attributes {stable_mosaic.version = 11 : i64} {
  func.func @fused_forward_kernel(%arg0: memref<2x8x32xf32, #tpu.memory_space<vmem>>, %arg1: memref<2x8xf32, #tpu.memory_space<vmem>>, %arg2: memref<32x32xf32, #tpu.memory_space<vmem>>, %arg3: memref<32x32xf32, #tpu.memory_space<vmem>>, %arg4: memref<32x32xf32, #tpu.memory_space<vmem>>, %arg5: memref<32x32xf32, #tpu.memory_space<vmem>>, %arg6: memref<32x128xf32, #tpu.memory_space<vmem>>, %arg7: memref<128x32xf32, #tpu.memory_space<vmem>>, %arg8: memref<32x32xf32, #tpu.memory_space<vmem>>, %arg9: memref<32x128xf32, #tpu.memory_space<vmem>>, %arg10: memref<12x128xf32, #tpu.memory_space<vmem>>, %arg11: memref<2x128xf32, #tpu.memory_space<vmem>>) attributes {dimension_semantics = [], scalar_prefetch = 0 : i64, scratch_operands = 0 : i64, tpu.core_type = #tpu.core_type<tc>} {
    %c0 = arith.constant 0 : index
    %c0_0 = arith.constant 0 : index
    %c0_1 = arith.constant 0 : index
    %0 = vector.load %arg0[%c0, %c0_0, %c0_1] : memref<2x8x32xf32, #tpu.memory_space<vmem>>, vector<2x8x32xf32>
    %c0_2 = arith.constant 0 : index
    %c0_3 = arith.constant 0 : index
    %1 = vector.load %arg1[%c0_2, %c0_3] : memref<2x8xf32, #tpu.memory_space<vmem>>, vector<2x8xf32>
    %c0_4 = arith.constant 0 : index
    %c0_5 = arith.constant 0 : index
    %2 = vector.load %arg10[%c0_4, %c0_5] : memref<12x128xf32, #tpu.memory_space<vmem>>, vector<12x128xf32>
    %3 = vector.extract_strided_slice %2 {offsets = [0, 0], sizes = [1, 32], strides = [1, 1]} : vector<12x128xf32> to vector<1x32xf32>
    %4 = vector.extract_strided_slice %2 {offsets = [1, 0], sizes = [1, 32], strides = [1, 1]} : vector<12x128xf32> to vector<1x32xf32>
    %5 = vector.extract_strided_slice %2 {offsets = [2, 0], sizes = [1, 32], strides = [1, 1]} : vector<12x128xf32> to vector<1x32xf32>
    %6 = vector.extract_strided_slice %2 {offsets = [3, 0], sizes = [1, 32], strides = [1, 1]} : vector<12x128xf32> to vector<1x32xf32>
    %7 = vector.extract_strided_slice %2 {offsets = [4, 0], sizes = [1, 32], strides = [1, 1]} : vector<12x128xf32> to vector<1x32xf32>
    %8 = vector.extract_strided_slice %2 {offsets = [5, 0], sizes = [1, 32], strides = [1, 1]} : vector<12x128xf32> to vector<1x32xf32>
    %9 = vector.extract_strided_slice %2 {offsets = [6, 0], sizes = [1, 128], strides = [1, 1]} : vector<12x128xf32> to vector<1x128xf32>
    %10 = vector.extract_strided_slice %2 {offsets = [7, 0], sizes = [1, 32], strides = [1, 1]} : vector<12x128xf32> to vector<1x32xf32>
    %11 = vector.extract_strided_slice %2 {offsets = [8, 0], sizes = [1, 32], strides = [1, 1]} : vector<12x128xf32> to vector<1x32xf32>
    %12 = vector.extract_strided_slice %2 {offsets = [9, 0], sizes = [1, 32], strides = [1, 1]} : vector<12x128xf32> to vector<1x32xf32>
    %13 = vector.extract_strided_slice %2 {offsets = [10, 0], sizes = [1, 32], strides = [1, 1]} : vector<12x128xf32> to vector<1x32xf32>
    %14 = vector.extract_strided_slice %2 {offsets = [11, 0], sizes = [1, 128], strides = [1, 1]} : vector<12x128xf32> to vector<1x128xf32>
    %15 = vector.shape_cast %0 : vector<2x8x32xf32> to vector<16x32xf32>
    %c0_6 = arith.constant 0 : index
    %c0_7 = arith.constant 0 : index
    %16 = vector.load %arg2[%c0_6, %c0_7] : memref<32x32xf32, #tpu.memory_space<vmem>>, vector<32x32xf32>
    %cst = arith.constant dense<0.000000e+00> : vector<16x32xf32>
    %17 = tpu.matmul %15, %16, %cst {dimension_numbers = #tpu.dot_dimension_numbers<[1], [0], [0], [1], [0, 0, 1, 1], [], []>} : vector<16x32xf32>, vector<32x32xf32>, vector<16x32xf32> -> vector<16x32xf32>
    %18 = vector.broadcast %3 : vector<1x32xf32> to vector<16x32xf32>
    %19 = arith.addf %17, %18 : vector<16x32xf32>
    %20 = vector.shape_cast %19 : vector<16x32xf32> to vector<2x8x32xf32>
    %c0_8 = arith.constant 0 : index
    %c0_9 = arith.constant 0 : index
    %21 = vector.load %arg3[%c0_8, %c0_9] : memref<32x32xf32, #tpu.memory_space<vmem>>, vector<32x32xf32>
    %cst_10 = arith.constant dense<0.000000e+00> : vector<16x32xf32>
    %22 = tpu.matmul %15, %21, %cst_10 {dimension_numbers = #tpu.dot_dimension_numbers<[1], [0], [0], [1], [0, 0, 1, 1], [], []>} : vector<16x32xf32>, vector<32x32xf32>, vector<16x32xf32> -> vector<16x32xf32>
    %23 = vector.broadcast %4 : vector<1x32xf32> to vector<16x32xf32>
    %24 = arith.addf %22, %23 : vector<16x32xf32>
    %25 = vector.shape_cast %24 : vector<16x32xf32> to vector<2x8x32xf32>
    %c0_11 = arith.constant 0 : index
    %c0_12 = arith.constant 0 : index
    %26 = vector.load %arg4[%c0_11, %c0_12] : memref<32x32xf32, #tpu.memory_space<vmem>>, vector<32x32xf32>
    %cst_13 = arith.constant dense<0.000000e+00> : vector<16x32xf32>
    %27 = tpu.matmul %15, %26, %cst_13 {dimension_numbers = #tpu.dot_dimension_numbers<[1], [0], [0], [1], [0, 0, 1, 1], [], []>} : vector<16x32xf32>, vector<32x32xf32>, vector<16x32xf32> -> vector<16x32xf32>
    %28 = vector.broadcast %5 : vector<1x32xf32> to vector<16x32xf32>
    %29 = arith.addf %27, %28 : vector<16x32xf32>
    %30 = vector.shape_cast %29 : vector<16x32xf32> to vector<2x8x32xf32>
    %cst_14 = arith.constant dense<0.000000e+00> : vector<2x8x8xf32>
    %31 = tpu.matmul %20, %25, %cst_14 {dimension_numbers = #tpu.dot_dimension_numbers<[2], [2], [1], [1], [0, 0, 0, 1, 1, 1], [0], [0]>} : vector<2x8x32xf32>, vector<2x8x32xf32>, vector<2x8x8xf32> -> vector<2x8x8xf32>
    %cst_15 = arith.constant 0.176776692 : f32
    %32 = vector.broadcast %cst_15 : f32 to vector<2x8x8xf32>
    %33 = arith.mulf %31, %32 : vector<2x8x8xf32>
    %cst_16 = arith.constant 1.000000e+00 : f32
    %34 = vector.broadcast %cst_16 : f32 to vector<2x8xf32>
    %35 = arith.subf %34, %1 : vector<2x8xf32>
    %cst_17 = arith.constant -1.000000e+09 : f32
    %36 = vector.broadcast %cst_17 : f32 to vector<2x8xf32>
    %37 = arith.mulf %35, %36 : vector<2x8xf32>
    %38 = vector.shape_cast %37 : vector<2x8xf32> to vector<2x1x8xf32>
    %39 = vector.broadcast %38 : vector<2x1x8xf32> to vector<2x8x8xf32>
    %40 = arith.addf %33, %39 : vector<2x8x8xf32>
    %cst_18 = arith.constant dense<0xFF800000> : vector<2x8xf32>
    %41 = vector.multi_reduction <maximumf>, %40, %cst_18 [2] : vector<2x8x8xf32> to vector<2x8xf32>
    %42 = vector.shape_cast %41 : vector<2x8xf32> to vector<2x8x1xf32>
    %43 = vector.broadcast %42 : vector<2x8x1xf32> to vector<2x8x8xf32>
    %44 = arith.subf %40, %43 : vector<2x8x8xf32>
    %45 = math.exp %44 : vector<2x8x8xf32>
    %cst_19 = arith.constant dense<0.000000e+00> : vector<2x8xf32>
    %46 = vector.multi_reduction <add>, %45, %cst_19 [2] : vector<2x8x8xf32> to vector<2x8xf32>
    %47 = vector.shape_cast %46 : vector<2x8xf32> to vector<2x8x1xf32>
    %48 = tpu.reciprocal %47 {approx = true} : vector<2x8x1xf32> -> vector<2x8x1xf32>
    %49 = vector.broadcast %48 : vector<2x8x1xf32> to vector<2x8x8xf32>
    %50 = arith.mulf %45, %49 : vector<2x8x8xf32>
    %cst_20 = arith.constant dense<0.000000e+00> : vector<2x8x32xf32>
    %51 = tpu.matmul %50, %30, %cst_20 {dimension_numbers = #tpu.dot_dimension_numbers<[2], [1], [1], [2], [0, 0, 0, 1, 1, 2], [0], [0]>} : vector<2x8x8xf32>, vector<2x8x32xf32>, vector<2x8x32xf32> -> vector<2x8x32xf32>
    %52 = vector.shape_cast %51 : vector<2x8x32xf32> to vector<16x32xf32>
    %c0_21 = arith.constant 0 : index
    %c0_22 = arith.constant 0 : index
    %53 = vector.load %arg5[%c0_21, %c0_22] : memref<32x32xf32, #tpu.memory_space<vmem>>, vector<32x32xf32>
    %cst_23 = arith.constant dense<0.000000e+00> : vector<16x32xf32>
    %54 = tpu.matmul %52, %53, %cst_23 {dimension_numbers = #tpu.dot_dimension_numbers<[1], [0], [0], [1], [0, 0, 1, 1], [], []>} : vector<16x32xf32>, vector<32x32xf32>, vector<16x32xf32> -> vector<16x32xf32>
    %55 = vector.broadcast %6 : vector<1x32xf32> to vector<16x32xf32>
    %56 = arith.addf %54, %55 : vector<16x32xf32>
    %57 = arith.addf %15, %56 : vector<16x32xf32>
    %cst_24 = arith.constant dense<0.000000e+00> : vector<16xf32>
    %58 = vector.multi_reduction <add>, %57, %cst_24 [1] : vector<16x32xf32> to vector<16xf32>
    %59 = vector.shape_cast %58 : vector<16xf32> to vector<16x1xf32>
    %cst_25 = arith.constant 3.200000e+01 : f32
    %60 = vector.broadcast %cst_25 : f32 to vector<16x1xf32>
    %61 = arith.divf %59, %60 : vector<16x1xf32>
    %62 = vector.broadcast %61 : vector<16x1xf32> to vector<16x32xf32>
    %63 = arith.subf %57, %62 : vector<16x32xf32>
    %64 = arith.mulf %63, %63 : vector<16x32xf32>
    %cst_26 = arith.constant dense<0.000000e+00> : vector<16xf32>
    %65 = vector.multi_reduction <add>, %64, %cst_26 [1] : vector<16x32xf32> to vector<16xf32>
    %66 = vector.shape_cast %65 : vector<16xf32> to vector<16x1xf32>
    %cst_27 = arith.constant 3.200000e+01 : f32
    %67 = vector.broadcast %cst_27 : f32 to vector<16x1xf32>
    %68 = arith.divf %66, %67 : vector<16x1xf32>
    %69 = vector.broadcast %61 : vector<16x1xf32> to vector<16x32xf32>
    %70 = arith.subf %57, %69 : vector<16x32xf32>
    %cst_28 = arith.constant 9.99999996E-13 : f32
    %71 = vector.broadcast %cst_28 : f32 to vector<16x1xf32>
    %72 = arith.addf %68, %71 : vector<16x1xf32>
    %73 = math.rsqrt %72 : vector<16x1xf32>
    %74 = vector.broadcast %73 : vector<16x1xf32> to vector<16x32xf32>
    %75 = arith.mulf %70, %74 : vector<16x32xf32>
    %76 = vector.broadcast %7 : vector<1x32xf32> to vector<16x32xf32>
    %77 = arith.mulf %75, %76 : vector<16x32xf32>
    %78 = vector.broadcast %8 : vector<1x32xf32> to vector<16x32xf32>
    %79 = arith.addf %77, %78 : vector<16x32xf32>
    %c0_29 = arith.constant 0 : index
    %c0_30 = arith.constant 0 : index
    %80 = vector.load %arg6[%c0_29, %c0_30] : memref<32x128xf32, #tpu.memory_space<vmem>>, vector<32x128xf32>
    %cst_31 = arith.constant dense<0.000000e+00> : vector<16x128xf32>
    %81 = tpu.matmul %79, %80, %cst_31 {dimension_numbers = #tpu.dot_dimension_numbers<[1], [0], [0], [1], [0, 0, 1, 1], [], []>} : vector<16x32xf32>, vector<32x128xf32>, vector<16x128xf32> -> vector<16x128xf32>
    %82 = vector.broadcast %9 : vector<1x128xf32> to vector<16x128xf32>
    %83 = arith.addf %81, %82 : vector<16x128xf32>
    %84 = arith.mulf %83, %83 : vector<16x128xf32>
    %85 = arith.mulf %83, %84 : vector<16x128xf32>
    %cst_32 = arith.constant 4.471500e-02 : f32
    %86 = vector.broadcast %cst_32 : f32 to vector<16x128xf32>
    %87 = arith.mulf %86, %85 : vector<16x128xf32>
    %88 = arith.addf %83, %87 : vector<16x128xf32>
    %cst_33 = arith.constant 0.797884583 : f32
    %89 = vector.broadcast %cst_33 : f32 to vector<16x128xf32>
    %90 = arith.mulf %89, %88 : vector<16x128xf32>
    %91 = math.tanh %90 : vector<16x128xf32>
    %cst_34 = arith.constant 1.000000e+00 : f32
    %92 = vector.broadcast %cst_34 : f32 to vector<16x128xf32>
    %93 = arith.addf %92, %91 : vector<16x128xf32>
    %cst_35 = arith.constant 5.000000e-01 : f32
    %94 = vector.broadcast %cst_35 : f32 to vector<16x128xf32>
    %95 = arith.mulf %94, %93 : vector<16x128xf32>
    %96 = arith.mulf %83, %95 : vector<16x128xf32>
    %c0_36 = arith.constant 0 : index
    %c0_37 = arith.constant 0 : index
    %97 = vector.load %arg7[%c0_36, %c0_37] : memref<128x32xf32, #tpu.memory_space<vmem>>, vector<128x32xf32>
    %cst_38 = arith.constant dense<0.000000e+00> : vector<16x32xf32>
    %98 = tpu.matmul %96, %97, %cst_38 {dimension_numbers = #tpu.dot_dimension_numbers<[1], [0], [0], [1], [0, 0, 1, 1], [], []>} : vector<16x128xf32>, vector<128x32xf32>, vector<16x32xf32> -> vector<16x32xf32>
    %99 = vector.broadcast %10 : vector<1x32xf32> to vector<16x32xf32>
    %100 = arith.addf %98, %99 : vector<16x32xf32>
    %101 = arith.addf %79, %100 : vector<16x32xf32>
    %cst_39 = arith.constant dense<0.000000e+00> : vector<16xf32>
    %102 = vector.multi_reduction <add>, %101, %cst_39 [1] : vector<16x32xf32> to vector<16xf32>
    %103 = vector.shape_cast %102 : vector<16xf32> to vector<16x1xf32>
    %cst_40 = arith.constant 3.200000e+01 : f32
    %104 = vector.broadcast %cst_40 : f32 to vector<16x1xf32>
    %105 = arith.divf %103, %104 : vector<16x1xf32>
    %106 = vector.broadcast %105 : vector<16x1xf32> to vector<16x32xf32>
    %107 = arith.subf %101, %106 : vector<16x32xf32>
    %108 = arith.mulf %107, %107 : vector<16x32xf32>
    %cst_41 = arith.constant dense<0.000000e+00> : vector<16xf32>
    %109 = vector.multi_reduction <add>, %108, %cst_41 [1] : vector<16x32xf32> to vector<16xf32>
    %110 = vector.shape_cast %109 : vector<16xf32> to vector<16x1xf32>
    %cst_42 = arith.constant 3.200000e+01 : f32
    %111 = vector.broadcast %cst_42 : f32 to vector<16x1xf32>
    %112 = arith.divf %110, %111 : vector<16x1xf32>
    %113 = vector.broadcast %105 : vector<16x1xf32> to vector<16x32xf32>
    %114 = arith.subf %101, %113 : vector<16x32xf32>
    %cst_43 = arith.constant 9.99999996E-13 : f32
    %115 = vector.broadcast %cst_43 : f32 to vector<16x1xf32>
    %116 = arith.addf %112, %115 : vector<16x1xf32>
    %117 = math.rsqrt %116 : vector<16x1xf32>
    %118 = vector.broadcast %117 : vector<16x1xf32> to vector<16x32xf32>
    %119 = arith.mulf %114, %118 : vector<16x32xf32>
    %120 = vector.broadcast %11 : vector<1x32xf32> to vector<16x32xf32>
    %121 = arith.mulf %119, %120 : vector<16x32xf32>
    %122 = vector.broadcast %12 : vector<1x32xf32> to vector<16x32xf32>
    %123 = arith.addf %121, %122 : vector<16x32xf32>
    %124 = vector.shape_cast %123 : vector<16x32xf32> to vector<2x8x32xf32>
    %125 = vector.extract_strided_slice %124 {offsets = [0, 0, 0], sizes = [2, 1, 32], strides = [1, 1, 1]} : vector<2x8x32xf32> to vector<2x1x32xf32>
    %126 = vector.shape_cast %125 : vector<2x1x32xf32> to vector<2x32xf32>
    %c0_44 = arith.constant 0 : index
    %c0_45 = arith.constant 0 : index
    %127 = vector.load %arg8[%c0_44, %c0_45] : memref<32x32xf32, #tpu.memory_space<vmem>>, vector<32x32xf32>
    %cst_46 = arith.constant dense<0.000000e+00> : vector<2x32xf32>
    %128 = tpu.matmul %126, %127, %cst_46 {dimension_numbers = #tpu.dot_dimension_numbers<[1], [0], [0], [1], [0, 0, 1, 1], [], []>} : vector<2x32xf32>, vector<32x32xf32>, vector<2x32xf32> -> vector<2x32xf32>
    %129 = vector.broadcast %13 : vector<1x32xf32> to vector<2x32xf32>
    %130 = arith.addf %128, %129 : vector<2x32xf32>
    %131 = math.tanh %130 : vector<2x32xf32>
    %c0_47 = arith.constant 0 : index
    %c0_48 = arith.constant 0 : index
    %132 = vector.load %arg9[%c0_47, %c0_48] : memref<32x128xf32, #tpu.memory_space<vmem>>, vector<32x128xf32>
    %cst_49 = arith.constant dense<0.000000e+00> : vector<2x128xf32>
    %133 = tpu.matmul %131, %132, %cst_49 {dimension_numbers = #tpu.dot_dimension_numbers<[1], [0], [0], [1], [0, 0, 1, 1], [], []>} : vector<2x32xf32>, vector<32x128xf32>, vector<2x128xf32> -> vector<2x128xf32>
    %134 = vector.broadcast %14 : vector<1x128xf32> to vector<2x128xf32>
    %135 = arith.addf %133, %134 : vector<2x128xf32>
    %c0_50 = arith.constant 0 : index
    %c0_51 = arith.constant 0 : index
    %136 = vector.load %arg11[%c0_50, %c0_51] : memref<2x128xf32, #tpu.memory_space<vmem>>, vector<2x128xf32>
    tpu.vector_store %arg11[%c0_50, %c0_51], %135 {strides = array<i32>} : memref<2x128xf32, #tpu.memory_space<vmem>>, vector<2x128xf32>,
    return
  }
}

</mosaic_0001>

<bundles_post_ra>
// kernel: tpu_custom_call.1
= control target key start
LH: loop header
LB: loop body
LE: loop exit
PB: predicated region body
PF: predicated region fallthrough
CT: control target
= control target key end

     0   :  { %16 = vsyncpa [#allocation3], 0  ;;  %s2045_s0 = inlined_call_operand.hbm [shape: f32[2,8,32], index: 0, kind: input, shape index: {}]   ;;  %s2046_s1 = inlined_call_operand.vmem [shape: f32[2,8], index: 1, kind: input, shape index: {}]   ;;  %s2047_s2 = inlined_call_operand.vmem [shape: f32[32,32], index: 2, kind: input, shape index: {}]   ;;  %s2048_s3 = inlined_call_operand.vmem [shape: f32[32,32], index: 3, kind: input, shape index: {}]   ;;  %s2049_s4 = inlined_call_operand.vmem [shape: f32[32,32], index: 4, kind: input, shape index: {}]   ;;  %s2050_s5 = inlined_call_operand.vmem [shape: f32[32,32], index: 5, kind: input, shape index: {}]   ;;  %s2051_s6 = inlined_call_operand.vmem [shape: f32[32,128], index: 6, kind: input, shape index: {}]   ;;  %s2052_s7 = inlined_call_operand.vmem [shape: f32[128,32], index: 7, kind: input, shape index: {}]   ;;  %s2053_s8 = inlined_call_operand.hbm [shape: f32[32,32], index: 8, kind: input, shape index: {}]   ;;  %s2054_s9 = inlined_call_operand.vmem [shape: f32[32,128], index: 9, kind: input, shape index: {}]   ;;  %s2055_s10 = inlined_call_operand.hbm [shape: f32[12,128], index: 10, kind: input, shape index: {}]   ;;  %s2056_s11 = inlined_call_operand.hbm [shape: f32[2,128], index: 11, kind: output, shape index: {}]  }
   0x1   :  { %17 = vsyncpa [#allocation6], 0 }
   0x2   :  { %18 = vsyncpa [#allocation4], 0  ;;  %s1683_s17 = smov [#allocation5]   ;;  %s1684_s19 = smov [#allocation2]  }
   0x3   :  { %s50_s18 = sshll.u32 %s1683_s17, 4  ;;  %s24_s20 = sshll.u32 %s1684_s19, 4  ;;  %s51_s18 = int_to_ptr.vmem [resolvable:$true] %s50_s18  ;;  %s1753_s20 = int_to_ptr.vmem [resolvable:$true] %s24_s20 }
   0x4   :  { %s1589_s23 = scalar_lea.hbm %s2053_s8, 512 }
   0x5   :  { %p1590_p0 = scmp.ne.s32.totalorder %s2053_s8, %s1589_s23  ;;  %p1593_p1 = scmp.lt.u32.totalorder %s1589_s23, %s2053_s8 }
   0x7   :  { %p1595_p2 = pnand %p1593_p1, %p1590_p0 }
   0x9   :  { %1598 = shalt.err (!%p1595_p2)
}
   0xa   :  { %s1599_s28 = scalar_lea.vmem %s51_s18, 512  ;;  %p1604_p4 = scmp.lt.s32.totalorder %s51_s18, %s51_s18 }
   0xb   :  { %p1600_p3 = scmp.ne.s32.totalorder %s51_s18, %s1599_s28  ;;  %p1605_p5 = scmp.lt.s32.totalorder %s1599_s28, %s1599_s28 }
   0xd   :  { %p1606_p6 = por %p1605_p5, %p1604_p4 }
   0xf   :  { %p1607_p7 = pnand %p1606_p6, %p1600_p3 }
  0x11   :  { %1610 = shalt.err (!%p1607_p7)
}
  0x12   :  { %s1685_s29 = smov 128   ;;  %s1686_s30 = smov 8  }
  0x13   :  { %56 = dma.hbm_to_vmem [thread:$0]  %s2053_s8, 512, %s51_s18, [#allocation6], %s1685_s29, %s1685_s29, %s1686_s30  }
  0x14   :  { %s1611_s16 = scalar_lea.hbm %s2045_s0, 256 }
  0x15   :  { %p1612_p8 = scmp.ne.s32.totalorder %s2045_s0, %s1611_s16  ;;  %p1615_p9 = scmp.lt.u32.totalorder %s1611_s16, %s2045_s0 }
  0x17   :  { %p1617_p10 = pnand %p1615_p9, %p1612_p8 }
  0x19   :  { %1620 = shalt.err (!%p1617_p10)
}
  0x1a   :  { %s1621_s23 = scalar_lea.vmem %s1753_s20, 256  ;;  %p1626_p12 = scmp.lt.s32.totalorder %s1753_s20, %s1753_s20 }
  0x1b   :  { %p1622_p11 = scmp.ne.s32.totalorder %s1753_s20, %s1621_s23  ;;  %p1627_p13 = scmp.lt.s32.totalorder %s1621_s23, %s1621_s23 }
  0x1d   :  { %p1628_p0 = por %p1627_p13, %p1626_p12 }
  0x1f   :  { %p1629_p1 = pnand %p1628_p0, %p1622_p11 }
  0x21   :  { %1632 = shalt.err (!%p1629_p1)
}
  0x22   :  { %30 = dma.hbm_to_vmem [thread:$0]  %s2045_s0, 256, %s1753_s20, [#allocation3], %s1685_s29, %s1685_s29, %s1686_s30  }
  0x23   :  { %s1687_s24 = smov [#allocation7]   ;;  %s1633_s28 = scalar_lea.hbm %s2055_s10, 256 }
  0x24   :  { %s64_s25 = sshll.u32 %s1687_s24, 4  ;;  %p1634_p2 = scmp.ne.s32.totalorder %s2055_s10, %s1633_s28  ;;  %s65_s25 = int_to_ptr.vmem [resolvable:$true] %s64_s25 }
  0x25   :  { %p1637_p3 = scmp.lt.u32.totalorder %s1633_s28, %s2055_s10 }
  0x27   :  { %p1639_p4 = pnand %p1637_p3, %p1634_p2 }
  0x29   :  { %1642 = shalt.err (!%p1639_p4)
}
  0x2a   :  { %s1643_s16 = scalar_lea.vmem %s65_s25, 256  ;;  %p1648_p6 = scmp.lt.s32.totalorder %s65_s25, %s65_s25 }
  0x2b   :  { %p1644_p5 = scmp.ne.s32.totalorder %s65_s25, %s1643_s16  ;;  %p1649_p7 = scmp.lt.s32.totalorder %s1643_s16, %s1643_s16 }
  0x2d   :  { %p1650_p8 = por %p1649_p7, %p1648_p6 }
  0x2f   :  { %p1651_p9 = pnand %p1650_p8, %p1644_p5 }
  0x31   :  { %1654 = shalt.err (!%p1651_p9)
}
  0x32   :  { %70 = dma.hbm_to_vmem [thread:$0]  %s2055_s10, 256, %s65_s25, [#allocation6], %s1685_s29, %s1685_s29, %s1686_s30  }
  0x33   :  { %1677 = dma.done.wait [#allocation3], 256  }
  0x34   :  { %1678 = vsyncadd [#allocation3], 4294967040 }
  0x35   :  { %1679 = dma.done.wait [#allocation6], 768  }
  0x36   :  { %1680 = vsyncadd [#allocation6], 4294966528  ;;  %vm93_vm0 = vcmask 261120   ;;  %v85_v0 = vld [vmem:[%s2047_s2] sm:$0xff]  ;;  %v86_v1 = vld [vmem:[%s2047_s2 + $0x8] sm:$0xff]  ;;  %v1688_v14 = vmov 0.0   ;;  %v89_v15 = vlaneseq }
  0x37   :  { %v87_v2 = vld [vmem:[%s2047_s2 + $0x10] sm:$0xff]  ;;  %v1473_v3 = vpack.c.bf16 %v86_v1, %v85_v0  ;;  %v88_v4 = vld [vmem:[%s2047_s2 + $0x18] sm:$0xff]  ;;  %v1817_v5 = vld [vmem:[#allocation2] sm:$0xff]  ;;  %vm1689_vm1 = vmmov 0   ;;  %v1690_v36 = vmov 1966171168  }
  0x38   :  { %v1477_v6 = vpack.c.bf16 %v88_v4, %v87_v2  ;;  %1349 = vmatprep.mubr.msk.f32.mxu1 %vm93_vm0, %v1817_v5  ;;  %v175_v7 = vld [vmem:[%s2048_s3] sm:$0xff]  ;;  %v176_v8 = vld [vmem:[%s2048_s3 + $0x8] sm:$0xff]  ;;  %1371 = vmatprep.mubr.msk.f32.mxu0 %vm93_vm0, %v1817_v5  ;;  %v177_v10 = vld [vmem:[%s2048_s3 + $0x10] sm:$0xff]  ;;  %v1846_v16 = vshrl.u32 %v89_v15, 7  ;;  %v499_v37 = vunpack.c.l.s4 %v1690_v36  ;;  %vm532_vm2 = vcmask 64512   ;;  %s1692_s19 = smov [#allocation8]  }
  0x39   :  { %1474 = vmatprep.subr.bf16.mxu1 %v1473_v3  ;;  %v1481_v9 = vpack.c.bf16 %v176_v8, %v175_v7  ;;  %v178_v11 = vld [vmem:[%s2048_s3 + $0x18] sm:$0xff]  ;;  %v1835_v12 = vld [vmem:[#allocation2 + $0x8] sm:$0xff]  ;;  %v1849_v20 = vld [vmem:[#allocation7] sm:$0xff]  ;;  %vm1084_vm3 = vcmask 1041409  }
  0x3a   :  { %1476 = vmatpush3.bf16.msra.mxu1 %v1473_v3  ;;  %v1485_v13 = vpack.c.bf16 %v178_v11, %v177_v10  ;;  %v181_v19 = vsub.s32 1, %v1846_v16  ;;  %v1852_v21 = vsub.s32 0, %v1846_v16  ;;  %v258_v30 = vld [vmem:[%s2049_s4] sm:$0xff]  ;;  %v259_v31 = vld [vmem:[%s2049_s4 + $0x8] sm:$0xff]  ;;  %v260_v32 = vld [vmem:[%s2049_s4 + $0x10] sm:$0xff]  ;;  %v500_v40 = vunpack.c.0.s8 %v499_v37 }
  0x3b   :  { %1478 = vmatprep.subr.bf16.mxu1 %v1477_v6  ;;  %v1489_v33 = vpack.c.bf16 %v259_v31, %v258_v30  ;;  %v261_v34 = vld [vmem:[%s2049_s4 + $0x18] sm:$0xff]  ;;  %v82_v38 = vld [vmem:[%s2046_s1] sm:$0x3]  ;;  %v702_v15 = vld [vmem:[%s2050_s5 + $0x8] sm:$0xff]  ;;  %s1247_s1 = sshll.u32 %s1692_s19, 4  ;;  %s1248_s1 = int_to_ptr.vmem [resolvable:$true] %s1247_s1 }
  0x3c   :  { %v182_v22 = vrot.slane %v1849_v20, %v181_v19  ;;  %v92_v24 = vrot.slane %v1849_v20, %v1852_v21  ;;  %v1493_v35 = vpack.c.bf16 %v261_v34, %v260_v32  ;;  %v495_v39 = vsub.f32 1.0, %v82_v38  ;;  %p1660_p11 = scmp.lt.s32.totalorder %s1248_s1, %s1248_s1 }
  0x3d   :  { %1490 = vmatprep.subr.bf16.mxu0 %v1489_v33  ;;  %v503_v42 = vsub.s32 %v500_v40, %v1846_v16  ;;  %v707_v34 = vsub.s32 3, %v1846_v16 }
  0x3e   :  { %1480 = vmatpush3.bf16.msra.mxu1 %v1477_v6  ;;  %1492 = vmatpush3.bf16.msra.mxu0 %v1489_v33  ;;  %v496_v41 = vmul.f32 -1e+09, %v495_v39  ;;  %v264_v6 = vsub.s32 2, %v1846_v16 }
  0x3f   :  { %1482 = vmatprep.subr.bf16.mxu1 %v1481_v9  ;;  %1494 = vmatprep.subr.bf16.mxu0 %v1493_v35 }
  0x40   :  { %v504_v43 = vrot.slane %v496_v41, %v503_v42  ;;  %v265_v7 = vrot.slane %v1849_v20, %v264_v6 }
  0x41   :  { %1350 = vmatmul.mubr.msk.f32.vlgmr.msra.gmra.mrb[0].mxu1 %vm93_vm0, %v1835_v12 }
  0x42   :  { %1484 = vmatpush3.bf16.msra.mxu1 %v1481_v9  ;;  %1360 = vmatprep.mubr.msk.f32.mxu1 %vm93_vm0, %v1817_v5  ;;  %v512_v44 = vrot.slane %v504_v43, %v503_v42  ;;  %v505_v45 = vcombine.high %v504_v43, %v504_v43 }
  0x43   :  { %1486 = vmatprep.subr.bf16.mxu1 %v1485_v13  ;;  %1496 = vmatpush3.bf16.msra.mxu0 %v1493_v35  ;;  %v708_v35 = vrot.slane %v1849_v20, %v707_v34 }
  0x44   :  { %1384 = vmatprep.subr.mxu0 %v1688_v14  ;;  %v523_v46 = vrot.slane %v512_v44, %v1852_v21  ;;  %v519_v47 = vrot.slane %v505_v45, %v503_v42 }
  0x46   :  { %1488 = vmatpush3.bf16.msra.mxu1 %v1485_v13  ;;  %1372 = vmatmul.mubr.msk.f32.vlgmr.msra.gmra.mrb[0].mxu0 %vm93_vm0, %v1835_v12  ;;  %v527_v52 = vrot.slane %v519_v47, %v1852_v21  ;;  %v701_v13 = vld [vmem:[%s2050_s5] sm:$0xff] }
  0x47   :  { %1374 = vmatprep.subr.mxu1 %v1688_v14  ;;  %1386 = vmatprep.mubr.msk.f32.mxu0 %vm1689_vm1, %v1688_v14 }
  0x49   :  { %1361 = vmatmul.mubr.msk.f32.vlgmr.msra.gmra.mrb[2].mxu1 %vm93_vm0, %v1835_v12 }
  0x4a   :  { %1376 = vmatprep.mubr.msk.f32.mxu1 %vm1689_vm1, %v1688_v14 }
 0x114   :  { %v1351_v17 = vpop.f32.mrb[0].mxu1 }
 0x115   :  { %v166_v18 = vpop.f32.mrb[1].mxu1  ;;  %v172_v29 = vadd.f32 %v1351_v17, %v92_v24  ;;  %v1497_v17 = vpack.c.bf16 %v702_v15, %v701_v13 }
 0x116   :  { %v167_v27 = vadd.f32 %v166_v18, %v92_v24 }
 0x119   :  { %v1373_v8 = vpop.f32.mrb[0].mxu0 }
 0x11a   :  { %v332_v9 = vpop.f32.mrb[1].mxu0  ;;  %v338_v11 = vadd.f32 %v1373_v8, %v265_v7 }
 0x11b   :  { %v333_v10 = vadd.f32 %v332_v9, %v265_v7 }
 0x11c   :  { %v1362_v23 = vpop.f32.mrb[2].mxu1 }
 0x11d   :  { %v249_v25 = vpop.f32.mrb[3].mxu1  ;;  %v255_v28 = vadd.f32 %v1362_v23, %v182_v22  ;;  %1385 = vmatpush3.msra.mxu0 %v333_v10 }
 0x11e   :  { %v250_v26 = vadd.f32 %v249_v25, %v182_v22  ;;  %1498 = vmatprep.subr.bf16.mxu0 %v1497_v17 }
 0x120   :  { %1375 = vmatpush3.xpose.msk.msra.mxu1 %vm93_vm0, %v250_v26 }
 0x121   :  { %1379 = vmatprep.subr.mxu1 %v1688_v14 }
 0x123   :  { %1377 = vmatmul.mubr.msk.f32.vlgmr.msra.gmra.mrb[4].mxu1 %vm93_vm0, %v167_v27  ;;  %v703_v27 = vld [vmem:[%s2050_s5 + $0x10] sm:$0xff] }
 0x124   :  { %1380 = vmatpush3.xpose.msk.msra.mxu1 %vm93_vm0, %v255_v28  ;;  %1381 = vmatprep.mubr.msk.f32.mxu1 %vm1689_vm1, %v1688_v14  ;;  %v704_v28 = vld [vmem:[%s2050_s5 + $0x18] sm:$0xff] }
 0x125   :  { %1389 = vmatprep.subr.mxu1 %v1688_v14 }
 0x127   :  { %1382 = vmatmul.mubr.msk.f32.vlgmr.msra.gmra.mrb[6].mxu1 %vm93_vm0, %v172_v29  ;;  %v1501_v29 = vpack.c.bf16 %v704_v28, %v703_v27  ;;  %v943_v27 = vld [vmem:[%s2052_s7 + $0x28] sm:$0xff] }
 0x128   :  { %1391 = vmatprep.mubr.msk.f32.mxu1 %vm1689_vm1, %v1688_v14  ;;  %1390 = vmatpush3.msra.mxu1 %v338_v11 }
 0x1f6   :  { %v413_v48 = vpop.f32.mrb[4].mxu1 }
 0x1f7   :  { %v493_v49 = vmul.f32 0.17677669, %v413_v48  ;;  %v1378_v50 = vpop.f32.mrb[5].mxu1 }
 0x1f9   :  { %v530_v51 = vadd.f32 %v523_v46, %v493_v49 }
 0x1fa   :  { %v489_v53 = vpop.f32.mrb[6].mxu1 }
 0x1fb   :  { %v494_v54 = vmul.f32 0.17677669, %v489_v53  ;;  %v1383_v55 = vpop.f32.mrb[7].mxu1  ;;  %v533_v56 = vsel %vm532_vm2, %v530_v51, -inf  ;;  %v832_v53 = vld [vmem:[%s2051_s6 + $0x8] sm:$0xff] }
 0x1fc   :  { %534 = vmax.xlane.f32.xlu0 %v533_v56  ;;  %v833_v55 = vld [vmem:[%s2051_s6 + $0x10] sm:$0xff]  ;;  %v834_v56 = vld [vmem:[%s2051_s6 + $0x18] sm:$0xff] }
 0x1fd   :  { %v531_v57 = vadd.f32 %v527_v52, %v494_v54 }
 0x1ff   :  { %v536_v58 = vsel %vm532_vm2, %v531_v57, -inf }
 0x200   :  { %537 = vmax.xlane.f32.xlu0 %v536_v58 }
 0x289   :  { %v535_v59 = vpop.xlane.xlu0 %534 }
 0x28a   :  { %v539_v60 = vsub.f32 %v530_v51, %v535_v59 }
 0x28c   :  { %v541_v61 = vmul.f32 1.442695, %v539_v60 }
 0x28d   :  { %v538_v62 = vpop.xlane.xlu0 %537 }
 0x28e   :  { %1567 = vpow2.f32 %v541_v61  ;;  %v540_v63 = vsub.f32 %v531_v57, %v538_v62  ;;  %v1509_v57 = vpack.c.bf16 %v834_v56, %v833_v55 }
 0x290   :  { %v543_v0 = vmul.f32 1.442695, %v540_v63 }
 0x292   :  { %1569 = vpow2.f32 %v543_v0  ;;  %v821_v0 = vsub.s32 4, %v1846_v16 }
 0x298   :  { %v1568_v1 = vpop.eup %1567 }
 0x299   :  { %v545_v2 = vsel %vm532_vm2, %v1568_v1, 0.0 }
 0x29a   :  { %546 = vadd.xlane.f32.xlu1 %v545_v2  ;;  %v822_v2 = vrot.slane %v1849_v20, %v821_v0 }
 0x29c   :  { %v1570_v3 = vpop.eup %1569 }
 0x29d   :  { %v548_v4 = vsel %vm532_vm2, %v1570_v3, 0.0 }
 0x29e   :  { %549 = vadd.xlane.f32.xlu1 %v548_v4 }
 0x327   :  { %v547_v18 = vpop.xlane.xlu1 %546 }
 0x328   :  { %1571 = vrcp.f32 %v547_v18  ;;  %v939_v18 = vld [vmem:[%s2052_s7 + $0x8] sm:$0xff] }
 0x32b   :  { %v550_v22 = vpop.xlane.xlu1 %549 }
 0x32c   :  { %1573 = vrcp.f32 %v550_v22 }
 0x332   :  { %v1572_v23 = vpop.eup %1571 }
 0x333   :  { %v553_v24 = vmul.f32 %v1572_v23, %v1568_v1  ;;  %v827_v1 = vsub.s32 5, %v1846_v16  ;;  %v940_v23 = vld [vmem:[%s2052_s7 + $0x10] sm:$0xff] }
 0x335   :  { %1387 = vmatmul.mubr.msk.f32.vlgmr.msra.gmra.mrb[2].mxu0 %vm532_vm2, %v553_v24  ;;  %v828_v9 = vrot.slane %v1849_v20, %v827_v1  ;;  %v941_v24 = vld [vmem:[%s2052_s7 + $0x18] sm:$0xff] }
 0x336   :  { %v1574_v25 = vpop.eup %1573  ;;  %1500 = vmatpush3.bf16.msra.mxu0 %v1497_v17  ;;  %v938_v17 = vld [vmem:[%s2052_s7] sm:$0xff] }
 0x337   :  { %v554_v26 = vmul.f32 %v1574_v25, %v1570_v3  ;;  %1502 = vmatprep.subr.bf16.mxu0 %v1501_v29  ;;  %v1513_v22 = vpack.c.bf16 %v939_v18, %v938_v17  ;;  %v1517_v25 = vpack.c.bf16 %v941_v24, %v940_v23 }
 0x339   :  { %1392 = vmatmul.mubr.msk.f32.vlgmr.msra.gmra.mrb[8].mxu1 %vm532_vm2, %v554_v26  ;;  %v942_v26 = vld [vmem:[%s2052_s7 + $0x20] sm:$0xff] }
 0x33a   :  { %1504 = vmatpush3.bf16.msra.mxu0 %v1501_v29  ;;  %v1521_v28 = vpack.c.bf16 %v943_v27, %v942_v26  ;;  %v944_v29 = vld [vmem:[%s2052_s7 + $0x30] sm:$0xff] }
 0x33b   :  { %1514 = vmatprep.subr.bf16.mxu0 %v1513_v22 }
 0x408   :  { %v624_v30 = vpop.f32.mrb[2].mxu0 }
 0x409   :  { %v1388_v31 = vpop.f32.mrb[3].mxu0  ;;  %1402 = vmatprep.mubr.msk.f32.mxu0 %vm93_vm0, %v624_v30  ;;  %v945_v30 = vld [vmem:[%s2052_s7 + $0x38] sm:$0xff] }
 0x40a   :  { %v1525_v31 = vpack.c.bf16 %v945_v30, %v944_v29 }
 0x40c   :  { %v697_v32 = vpop.f32.mrb[8].mxu1 }
 0x40d   :  { %v1393_v33 = vpop.f32.mrb[9].mxu1  ;;  %1403 = vmatmul.mubr.msk.f32.vlgmr.msra.gmra.mrb[4].mxu0 %vm93_vm0, %v697_v32  ;;  %v946_v32 = vld [vmem:[%s2052_s7 + $0x40] sm:$0xff] }
 0x40e   :  { %1516 = vmatpush3.bf16.msra.mxu0 %v1513_v22  ;;  %v947_v33 = vld [vmem:[%s2052_s7 + $0x48] sm:$0xff] }
 0x40f   :  { %1518 = vmatprep.subr.bf16.mxu0 %v1517_v25 }
 0x412   :  { %1520 = vmatpush3.bf16.msra.mxu0 %v1517_v25 }
 0x413   :  { %1522 = vmatprep.subr.bf16.mxu0 %v1521_v28 }
 0x416   :  { %1524 = vmatpush3.bf16.msra.mxu0 %v1521_v28 }
 0x417   :  { %1526 = vmatprep.subr.bf16.mxu0 %v1525_v31 }
 0x41a   :  { %1528 = vmatpush3.bf16.msra.mxu0 %v1525_v31  ;;  %v1074_v31 = vld [vmem:[#allocation5 + $0x8] sm:$0xff] }
 0x4e0   :  { %v1404_v36 = vpop.f32.mrb[4].mxu0 }
 0x4e1   :  { %v787_v37 = vadd.f32 %v1404_v36, %v708_v35  ;;  %v781_v38 = vpop.f32.mrb[5].mxu0  ;;  %v1529_v36 = vpack.c.bf16 %v947_v33, %v946_v32  ;;  %v1691_v33 = vmov 0.0|0.0  }
 0x4e2   :  { %v782_v39 = vadd.f32 %v781_v38, %v708_v35  ;;  %v948_v35 = vld [vmem:[%s2052_s7 + $0x50] sm:$0xff] }
 0x4e3   :  { %v791_v40 = vadd.f32 %v787_v37, %v1835_v12  ;;  %v949_v37 = vld [vmem:[%s2052_s7 + $0x58] sm:$0xff]  ;;  %1530 = vmatprep.subr.bf16.mxu0 %v1529_v36 }
 0x4e4   :  { %v790_v41 = vadd.f32 %v782_v39, %v1817_v5  ;;  %v831_v5 = vld [vmem:[%s2051_s6] sm:$0xff]  ;;  %v1533_v38 = vpack.c.bf16 %v949_v37, %v948_v35  ;;  %1532 = vmatpush3.bf16.msra.mxu0 %v1529_v36  ;;  %v1076_v36 = vld [vmem:[#allocation5 + $0x18] sm:$0xff] }
 0x4e5   :  { %v795_v42 = vsel %vm93_vm0, %v791_v40, 0.0  ;;  %v1505_v54 = vpack.c.bf16 %v832_v53, %v831_v5  ;;  %v950_v39 = vld [vmem:[%s2052_s7 + $0x60] sm:$0xff] }
 0x4e6   :  { %796 = vadd.xlane.f32.xlu1 %v795_v42  ;;  %v792_v43 = vsel %vm93_vm0, %v790_v41, 0.0  ;;  %1534 = vmatprep.subr.bf16.mxu0 %v1533_v38  ;;  %v952_v42 = vld [vmem:[%s2052_s7 + $0x70] sm:$0xff]  ;;  %v1075_v35 = vld [vmem:[#allocation5 + $0x10] sm:$0xff] }
 0x4e7   :  { %793 = vadd.xlane.f32.xlu0 %v792_v43  ;;  %1506 = vmatprep.subr.bf16.mxu1 %v1505_v54  ;;  %v953_v43 = vld [vmem:[%s2052_s7 + $0x78] sm:$0xff]  ;;  %v1549_v37 = vpack.c.bf16 %v1076_v36, %v1075_v35 }
 0x4e8   :  { %1508 = vmatpush3.bf16.msra.mxu1 %v1505_v54  ;;  %1536 = vmatpush3.bf16.msra.mxu0 %v1533_v38 }
 0x4e9   :  { %1510 = vmatprep.subr.bf16.mxu1 %v1509_v57 }
 0x4ec   :  { %1512 = vmatpush3.bf16.msra.mxu1 %v1509_v57 }
 0x4ed   :  { %1545 = vmatprep.subr.bf16.mxu1 %v1691_v33 }
 0x573   :  { %v797_v44 = vpop.xlane.xlu1 %796 }
 0x574   :  { %v800_v45 = vmul.f32 0.03125, %v797_v44  ;;  %v794_v46 = vpop.xlane.xlu0 %793  ;;  %v1541_v44 = vpack.c.bf16 %v953_v43, %v952_v42 }
 0x575   :  { %v799_v47 = vmul.f32 0.03125, %v794_v46 }
 0x576   :  { %v802_v48 = vsub.f32 %v791_v40, %v800_v45  ;;  %v951_v40 = vld [vmem:[%s2052_s7 + $0x68] sm:$0xff]  ;;  %v837_v45 = vsub.s32 6, %v1846_v16 }
 0x577   :  { %v801_v49 = vsub.f32 %v790_v41, %v799_v47  ;;  %v1537_v41 = vpack.c.bf16 %v951_v40, %v950_v39 }
 0x578   :  { %v804_v50 = vmul.f32 %v802_v48, %v802_v48  ;;  %v838_v46 = vrot.slane %v1849_v20, %v837_v45 }
 0x579   :  { %v803_v51 = vmul.f32 %v801_v49, %v801_v49  ;;  %1538 = vmatprep.subr.bf16.mxu0 %v1537_v41 }
 0x57a   :  { %v808_v52 = vsel %vm93_vm0, %v804_v50, 0.0  ;;  %1540 = vmatpush3.bf16.msra.mxu0 %v1537_v41 }
 0x57b   :  { %809 = vadd.xlane.f32.xlu1 %v808_v52  ;;  %v805_v12 = vsel %vm93_vm0, %v803_v51, 0.0  ;;  %1542 = vmatprep.subr.bf16.mxu0 %v1541_v44 }
 0x57c   :  { %806 = vadd.xlane.f32.xlu0 %v805_v12 }
 0x57e   :  { %1544 = vmatpush3.bf16.msra.mxu0 %v1541_v44  ;;  %v84_v44 = vld [vmem:[#allocation7 + $0x8] sm:$0xf] }
 0x57f   :  { %v1064_v45 = vrot.slane %v84_v44, %v1852_v21  ;;  %v1159_v21 = vld [vmem:[%s2054_s9] sm:$0xff] }
 0x608   :  { %v810_v58 = vpop.xlane.xlu1 %809 }
 0x609   :  { %v812_v59 = vmul.f32 0.03125, %v810_v58  ;;  %v807_v60 = vpop.xlane.xlu0 %806 }
 0x60a   :  { %v811_v61 = vmul.f32 0.03125, %v807_v60 }
 0x60b   :  { %v814_v62 = vadd.f32 1e-12, %v812_v59 }
 0x60c   :  { %v813_v63 = vadd.f32 1e-12, %v811_v61 }
 0x60d   :  { %1575 = vrsqrt.f32 %v814_v62 }
 0x60e   :  { %1577 = vrsqrt.f32 %v813_v63 }
 0x617   :  { %v1576_v3 = vpop.eup %1575 }
 0x618   :  { %v1578_v4 = vpop.eup %1577  ;;  %v818_v7 = vmul.f32 %v1576_v3, %v802_v48  ;;  %v956_v3 = vsub.s32 7, %v1846_v16 }
 0x619   :  { %v817_v8 = vmul.f32 %v1578_v4, %v801_v49 }
 0x61a   :  { %v824_v10 = vmul.f32 %v822_v2, %v818_v7  ;;  %v957_v4 = vrot.slane %v1849_v20, %v956_v3 }
 0x61b   :  { %v823_v11 = vmul.f32 %v822_v2, %v817_v8 }
 0x61c   :  { %v1944_v15 = vadd.f32 %v828_v9, %v824_v10 }
 0x61d   :  { %v1942_v13 = vadd.f32 %v828_v9, %v823_v11 }
 0x61f   :  { %1413 = vmatprep.mubr.msk.f32.mxu1 %vm93_vm0, %v1942_v13 }
 0x620   :  { %1414 = vmatmul.mubr.msk.f32.vlgmr.msra.gmra.mrb[10].mxu1 %vm93_vm0, %v1944_v15 }
 0x621   :  { %1459 = vmatprep.mubr.msk.f32.mxu1 %vm1689_vm1, %v1688_v14 }
 0x6f3   :  { %v1415_v47 = vpop.f32.mrb[10].mxu1 }
 0x6f4   :  { %v917_v48 = vadd.f32 %v1415_v47, %v838_v46  ;;  %v911_v49 = vpop.f32.mrb[11].mxu1 }
 0x6f5   :  { %v912_v50 = vadd.f32 %v911_v49, %v838_v46 }
 0x6f6   :  { %v921_v51 = vmul.f32 %v917_v48, %v917_v48 }
 0x6f7   :  { %v920_v52 = vmul.f32 %v912_v50, %v912_v50 }
 0x6f8   :  { %v923_v12 = vmul.f32 %v921_v51, %v917_v48 }
 0x6f9   :  { %v922_v5 = vmul.f32 %v920_v52, %v912_v50 }
 0x6fa   :  { %v925_v53 = vmul.f32 0.044715, %v923_v12 }
 0x6fb   :  { %v924_v54 = vmul.f32 0.044715, %v922_v5 }
 0x6fc   :  { %v927_v55 = vadd.f32 %v925_v53, %v917_v48 }
 0x6fd   :  { %v926_v56 = vadd.f32 %v924_v54, %v912_v50 }
 0x6fe   :  { %v929_v57 = vmul.f32 0.7978846, %v927_v55  ;;  %v1161_v55 = vld [vmem:[%s2054_s9 + $0x10] sm:$0xff] }
 0x6ff   :  { %v928_v58 = vmul.f32 0.7978846, %v926_v56 }
 0x700   :  { %1579 = vtanh.f32 %v929_v57  ;;  %v1162_v57 = vld [vmem:[%s2054_s9 + $0x18] sm:$0xff] }
 0x701   :  { %1581 = vtanh.f32 %v928_v58  ;;  %v1555_v58 = vpack.c.bf16 %v1162_v57, %v1161_v55 }
 0x70a   :  { %v1580_v59 = vpop.eup %1579 }
 0x70b   :  { %v1582_v60 = vpop.eup %1581  ;;  %v933_v61 = vadd.f32 1.0, %v1580_v59 }
 0x70c   :  { %v932_v62 = vadd.f32 1.0, %v1582_v60 }
 0x70d   :  { %v935_v63 = vmul.f32 0.5, %v933_v61 }
 0x70e   :  { %v934_v0 = vmul.f32 0.5, %v932_v62 }
 0x70f   :  { %v937_v2 = vmul.f32 %v935_v63, %v917_v48  ;;  %v1070_v48 = vrot.slane %v84_v44, %v181_v19  ;;  %v1160_v19 = vld [vmem:[%s2054_s9 + $0x8] sm:$0xff]  ;;  %v1166_v63 = vrot.slane %v84_v44, %v707_v34  ;;  %s1655_s9 = scalar_lea.vmem %s1248_s1, 32 }
 0x710   :  { %v936_v1 = vmul.f32 %v934_v0, %v912_v50  ;;  %v1552_v56 = vpack.c.bf16 %v1160_v19, %v1159_v21  ;;  %p1656_p10 = scmp.ne.s32.totalorder %s1248_s1, %s1655_s9  ;;  %p1661_p12 = scmp.lt.s32.totalorder %s1655_s9, %s1655_s9 }
 0x712   :  { %1448 = vmatprep.mubr.f32.mxu0 %v936_v1  ;;  %p1662_p13 = por %p1661_p12, %p1660_p11 }
 0x713   :  { %1449 = vmatmul.mubr.f32.vlgmr.msra.gmra.mrb[6].mxu0 %v937_v2 }
 0x714   :  { %p1663_p0 = pnand %p1662_p13, %p1656_p10 }
 0x7e6   :  { %v1450_v7 = vpop.f32.mrb[6].mxu0 }
 0x7e7   :  { %v1030_v8 = vadd.f32 %v1450_v7, %v957_v4  ;;  %v1024_v9 = vpop.f32.mrb[7].mxu0 }
 0x7e8   :  { %v1025_v10 = vadd.f32 %v1024_v9, %v957_v4 }
 0x7e9   :  { %v1034_v11 = vadd.f32 %v1030_v8, %v1944_v15 }
 0x7ea   :  { %v1033_v17 = vadd.f32 %v1025_v10, %v1942_v13  ;;  %v1073_v13 = vld [vmem:[#allocation5] sm:$0xff] }
 0x7eb   :  { %v1038_v18 = vsel %vm93_vm0, %v1034_v11, 0.0  ;;  %v1546_v32 = vpack.c.bf16 %v1074_v31, %v1073_v13 }
 0x7ec   :  { %1039 = vadd.xlane.f32.xlu0 %v1038_v18  ;;  %v1035_v22 = vsel %vm93_vm0, %v1033_v17, 0.0 }
 0x7ed   :  { %1036 = vadd.xlane.f32.xlu1 %v1035_v22  ;;  %1547 = vmatpush3.bf16.msra.mxu1 %v1546_v32 }
 0x7ee   :  { %1548 = vmatprep.subr.bf16.mxu1 %v1691_v33 }
 0x7f1   :  { %1550 = vmatpush3.bf16.msra.mxu1 %v1549_v37 }
 0x7f2   :  { %1551 = vmatprep.subr.bf16.mxu1 %v1691_v33 }
 0x879   :  { %v1040_v23 = vpop.xlane.xlu0 %1039 }
 0x87a   :  { %v1042_v24 = vmul.f32 0.03125, %v1040_v23  ;;  %v1037_v25 = vpop.xlane.xlu1 %1036 }
 0x87b   :  { %v1041_v26 = vmul.f32 0.03125, %v1037_v25 }
 0x87c   :  { %v1044_v27 = vsub.f32 %v1034_v11, %v1042_v24 }
 0x87d   :  { %v1043_v20 = vsub.f32 %v1033_v17, %v1041_v26 }
 0x87e   :  { %v1046_v28 = vmul.f32 %v1044_v27, %v1044_v27 }
 0x87f   :  { %v1045_v29 = vmul.f32 %v1043_v20, %v1043_v20 }
 0x880   :  { %v1050_v30 = vsel %vm93_vm0, %v1046_v28, 0.0 }
 0x881   :  { %1051 = vadd.xlane.f32.xlu0 %v1050_v30  ;;  %v1047_v15 = vsel %vm93_vm0, %v1045_v29, 0.0 }
 0x882   :  { %1048 = vadd.xlane.f32.xlu1 %v1047_v15 }
 0x90e   :  { %v1052_v38 = vpop.xlane.xlu0 %1051 }
 0x90f   :  { %v1054_v39 = vmul.f32 0.03125, %v1052_v38  ;;  %v1049_v40 = vpop.xlane.xlu1 %1048 }
 0x910   :  { %v1053_v41 = vmul.f32 0.03125, %v1049_v40 }
 0x911   :  { %v1056_v42 = vadd.f32 1e-12, %v1054_v39 }
 0x912   :  { %v1055_v43 = vadd.f32 1e-12, %v1053_v41 }
 0x913   :  { %1583 = vrsqrt.f32 %v1056_v42 }
 0x914   :  { %1585 = vrsqrt.f32 %v1055_v43 }
 0x91d   :  { %v1584_v46 = vpop.eup %1583 }
 0x91e   :  { %v1586_v47 = vpop.eup %1585  ;;  %v1060_v49 = vmul.f32 %v1584_v46, %v1044_v27 }
 0x91f   :  { %v1059_v50 = vmul.f32 %v1586_v47, %v1043_v20 }
 0x920   :  { %v1066_v51 = vmul.f32 %v1064_v45, %v1060_v49 }
 0x921   :  { %v1065_v52 = vmul.f32 %v1064_v45, %v1059_v50 }
 0x922   :  { %v1072_v12 = vadd.f32 %v1070_v48, %v1066_v51 }
 0x923   :  { %v1071_v5 = vadd.f32 %v1070_v48, %v1065_v52 }
 0x924   :  { %v1083_v53 = vrot.slane %v1072_v12, 7 }
 0x926   :  { %v1085_v54 = vsel %vm1084_vm3, %v1083_v53, %v1071_v5 }
 0x927   :  { %1460 = vmatmul.mubr.msk.f32.vlgmr.msra.gmra.mrb[12].mxu1 %vm93_vm0, %v1085_v54 }
 0x928   :  { %1470 = vmatprep.mubr.msk.f32.mxu1 %vm1689_vm1, %v1688_v14  ;;  %1553 = vmatpush3.bf16.msra.mxu1 %v1552_v56  ;;  %v1080_v14 = vrot.slane %v84_v44, %v264_v6 }
 0x929   :  { %1554 = vmatprep.subr.bf16.mxu1 %v1691_v33 }
 0x92c   :  { %1556 = vmatpush3.bf16.msra.mxu1 %v1555_v58 }
 0x9fa   :  { %v1154_v59 = vpop.f32.mrb[12].mxu1 }
 0x9fb   :  { %v1155_v60 = vadd.f32 %v1154_v59, %v1080_v14  ;;  %v1461_v61 = vpop.f32.mrb[13].mxu1 }
 0x9fd   :  { %1587 = vtanh.f32 %v1155_v60 }
 0xa07   :  { %v1588_v62 = vpop.eup %1587 }
 0xa08   :  { %1471 = vmatmul.mubr.msk.f32.vlgmr.msra.gmra.mrb[14].mxu1 %vm93_vm0, %v1588_v62 }
 0xadb   :  { %v1236_v0 = vpop.f32.mrb[14].mxu1 }
 0xadc   :  { %v1237_v1 = vadd.f32 %v1236_v0, %v1166_v63  ;;  %v1472_v2 = vpop.f32.mrb[15].mxu1 }
 0xade   :  { %1240 = vst [vmem:[#allocation8] sm:$0x3] %v1237_v1 }
 0xadf   :  { %1666 = shalt.err (!%p1663_p0)
}
 0xae0   :  { %s1667_s22 = scalar_lea.hbm %s2056_s11, 32 }
 0xae1   :  { %p1668_p1 = scmp.ne.s32.totalorder %s2056_s11, %s1667_s22  ;;  %p1671_p2 = scmp.lt.u32.totalorder %s1667_s22, %s2056_s11 }
 0xae3   :  { %p1673_p3 = pnand %p1671_p2, %p1668_p1 }
 0xae5   :  { %1676 = shalt.err (!%p1673_p3)
}
 0xae6   :  { %1250 = dma.vmem_to_hbm [thread:$0]  %s1248_s1, 32, %s2056_s11, [#allocation4]  }
 0xae7   :  { %1681 = dma.done.wait [#allocation4], 32  }
 0xae8   :  { %1682 = vsyncadd [#allocation4], 4294967264 }
 0xae9   :  { %1254 = vsyncpa [#allocation3], 1 }
 0xaea   :  { %1255 = vsyncpa [#allocation6], 1 }
 0xaeb   :  { %1256 = vsyncpa [#allocation4], 1 }

</bundles_post_ra>
